<compile_context>
chip_gen: v7x
topology: tpu7x:2x2x1
jax: 0.10.0
libtpu: 0.0.40
codegen_flags: <defaults>
</compile_context>

<pallas_src>
import jax
import jax.numpy as jnp
from jax.experimental import pallas as pl
from jax.experimental.pallas import tpu as pltpu


def make_dct_matrix(H: int, W: int, dtype=jnp.float32) -> jnp.ndarray:
    """Build the DCT basis matrix exactly as the torch module does."""
    N = float(W)
    pi = 3.1415926  # match the constant used in the PyTorch module
    i = jnp.arange(H, dtype=jnp.float32)[:, None]          # (H, 1)
    j = jnp.arange(W, dtype=jnp.float32)[None, :]          # (1, W)
    mat = jnp.cos(pi * i * (2.0 * j + 1.0) / (2.0 * N)) * jnp.sqrt(2.0 / N)
    row0 = jnp.full((1, W), jnp.sqrt(1.0 / N), dtype=jnp.float32)
    mat = jnp.concatenate([row0, mat[1:]], axis=0)
    return mat.astype(dtype)


def _round_up(x: int, m: int) -> int:
    return ((x + m - 1) // m) * m


def _dct2d_kernel(kt_ref, x_ref, o_ref):
    # kt_ref: (HW, HW)   transposed Kronecker DCT matrix, resident in VMEM
    # x_ref : (TB, HW)   a batch of flattened spatial slices (lane-dense)
    # o_ref : (TB, HW)
    y = jnp.dot(x_ref[...], kt_ref[...], preferred_element_type=jnp.float32)
    o_ref[...] = y.astype(o_ref.dtype)


def dct2d(x: jnp.ndarray, dct_C: jnp.ndarray) -> jnp.ndarray:
    """x: (B, C, H, W) float32 -> (B, C, H, W) 2-D DCT of each spatial slice."""
    B, C, H, W = x.shape
    assert H == W, "DCT2d requires square spatial dims (C @ x only typechecks if H == W)"
    M = B * C
    HW = H * W

    # Kronecker matrix: vec_row(C X C^T) = (C kron C) vec_row(X)
    K = jnp.kron(dct_C, dct_C)          # (HW, HW)
    Kt = jnp.transpose(K)               # so the kernel does X_flat @ K^T

    x_flat = x.reshape(M, HW)           # lane-dense view of the input (free reshape)

    # Batch tile: large enough to amortize per-step overhead, small enough to
    # fit double-buffered in/out blocks on v7x's 64 MiB VMEM.
    #   TB=1024 f32 rows of 256 -> 1 MiB per block, ~4.5 MiB total with
    #   double-buffering + the resident 256 KiB Kronecker matrix.
    TB = min(1024, _round_up(M, 8))
    M_pad = _round_up(M, TB)
    if M_pad != M:
        x_flat = jnp.pad(x_flat, ((0, M_pad - M), (0, 0)))

    out_flat = pl.pallas_call(
        _dct2d_kernel,
        out_shape=jax.ShapeDtypeStruct((M_pad, HW), x.dtype),
        grid_spec=pltpu.PrefetchScalarGridSpec(
            num_scalar_prefetch=0,
            grid=(M_pad // TB,),
            in_specs=[
                pl.BlockSpec((HW, HW), lambda i: (0, 0)),   # Kronecker matrix (resident)
                pl.BlockSpec((TB, HW), lambda i: (i, 0)),   # TB flattened slices per step
            ],
            out_specs=pl.BlockSpec((TB, HW), lambda i: (i, 0)),
        ),
        compiler_params=pltpu.CompilerParams(
            dimension_semantics=("parallel",),
            vmem_limit_bytes=32 * 1024 * 1024,  # safe on v5e/v6e/v7x; tile uses ~5 MiB
        ),
    )(Kt, x_flat)

    if M_pad != M:
        out_flat = out_flat[:M]
    return out_flat.reshape(B, C, H, W)


if __name__ == "__main__":
    B, C, H, W = 2, 4, 16, 16
    key = jax.random.PRNGKey(0)
    x = jax.random.normal(key, (B, C, H, W), dtype=jnp.float32)

    dct_C = make_dct_matrix(H, W)

    y = dct2d(x, dct_C)
    y = jax.block_until_ready(y)

    # Plain-JAX reference check (same math as the torch loop of torch.mm calls).
    y_ref = jnp.einsum("hk,bckw,wj->bchj", dct_C, x, dct_C.T)
    assert y.shape == (B, C, H, W)
    assert jnp.allclose(y, y_ref, atol=1e-4, rtol=1e-4)

    print("KERNEL_OK")
</pallas_src>

<mosaic_0001>
module attributes {stable_mosaic.version = 11 : i64} {
  func.func @_dct2d_kernel(%arg0: i32, %arg1: memref<256x256xf32, #tpu.memory_space<vmem>>, %arg2: memref<8x256xf32, #tpu.memory_space<vmem>>, %arg3: memref<8x256xf32, #tpu.memory_space<vmem>>) attributes {dimension_semantics = [#tpu.dimension_semantics<parallel>], iteration_bounds = array<i64: 1>, scalar_prefetch = 0 : i64, scratch_operands = 0 : i64, tpu.core_type = #tpu.core_type<tc>, window_params = [{pipeline_mode = #tpu.pipeline_mode<synchronous>, transform_indices = @transform_0, window_bounds = array<i64: 256, 256>}, {transform_indices = @transform_1, window_bounds = array<i64: 8, 256>}, {transform_indices = @transform_2, window_bounds = array<i64: 8, 256>}]} {
    %c0 = arith.constant 0 : index
    %c0_0 = arith.constant 0 : index
    %0 = vector.load %arg2[%c0, %c0_0] : memref<8x256xf32, #tpu.memory_space<vmem>>, vector<8x256xf32>
    %c0_1 = arith.constant 0 : index
    %c0_2 = arith.constant 0 : index
    %1 = vector.load %arg1[%c0_1, %c0_2] : memref<256x256xf32, #tpu.memory_space<vmem>>, vector<256x256xf32>
    %cst = arith.constant dense<0.000000e+00> : vector<8x256xf32>
    %2 = tpu.matmul %0, %1, %cst {dimension_numbers = #tpu.dot_dimension_numbers<[1], [0], [0], [1], [0, 0, 1, 1], [], []>} : vector<8x256xf32>, vector<256x256xf32>, vector<8x256xf32> -> vector<8x256xf32>
    %c0_3 = arith.constant 0 : index
    %c0_4 = arith.constant 0 : index
    %3 = vector.load %arg3[%c0_3, %c0_4] : memref<8x256xf32, #tpu.memory_space<vmem>>, vector<8x256xf32>
    tpu.vector_store %arg3[%c0_3, %c0_4], %2 {strides = array<i32>} : memref<8x256xf32, #tpu.memory_space<vmem>>, vector<8x256xf32>,
    return
  }
  func.func @transform_0(%arg0: i32) -> (i32, i32) {
    %c0_i32 = arith.constant 0 : i32
    %c0_i32_0 = arith.constant 0 : i32
    %c0_i32_1 = arith.constant 0 : i32
    return %c0_i32, %c0_i32_0 : i32, i32
  }
  func.func @transform_1(%arg0: i32) -> (i32, i32) {
    %c0_i32 = arith.constant 0 : i32
    %c0_i32_0 = arith.constant 0 : i32
    return %arg0, %c0_i32 : i32, i32
  }
  func.func @transform_2(%arg0: i32) -> (i32, i32) {
    %c0_i32 = arith.constant 0 : i32
    %c0_i32_0 = arith.constant 0 : i32
    return %arg0, %c0_i32 : i32, i32
  }
}

</mosaic_0001>

<bundles_post_ra>
// kernel: tpu_custom_call.1
= control target key start
LH: loop header
LB: loop body
LE: loop exit
PB: predicated region body
PF: predicated region fallthrough
CT: control target
= control target key end

     0   :  { %7 = vsyncpa [#allocation3], 0  ;;  %s390_s0 = inlined_call_operand.hbm [shape: f32[256,256], index: 0, kind: input, shape index: {}]   ;;  %s391_s1 = inlined_call_operand.hbm [shape: f32[8,256], index: 1, kind: input, shape index: {}]   ;;  %s392_s2 = inlined_call_operand.hbm [shape: f32[8,256], index: 2, kind: output, shape index: {}]  }
   0x1   :  { %8 = vsyncpa [#allocation6], 0 }
   0x2   :  { %9 = vsyncpa [#allocation4], 0  ;;  %s334_s9 = smov [#allocation2]   ;;  %s262_s13 = scalar_lea.hbm %s390_s0, 8192 }
   0x3   :  { %s15_s10 = sshll.u32 %s334_s9, 4  ;;  %p263_p0 = scmp.ne.s32.totalorder %s390_s0, %s262_s13  ;;  %s16_s10 = int_to_ptr.vmem [resolvable:$true] %s15_s10 }
   0x4   :  { %p266_p1 = scmp.lt.u32.totalorder %s262_s13, %s390_s0 }
   0x6   :  { %p268_p2 = pnand %p266_p1, %p263_p0 }
   0x8   :  { %271 = shalt.err (!%p268_p2)
}
   0x9   :  { %s272_s18 = scalar_lea.vmem %s16_s10, 8192  ;;  %p277_p4 = scmp.lt.s32.totalorder %s16_s10, %s16_s10 }
   0xa   :  { %p273_p3 = scmp.ne.s32.totalorder %s16_s10, %s272_s18  ;;  %p278_p5 = scmp.lt.s32.totalorder %s272_s18, %s272_s18 }
   0xc   :  { %p279_p6 = por %p278_p5, %p277_p4 }
   0xe   :  { %p280_p7 = pnand %p279_p6, %p273_p3 }
  0x10   :  { %283 = shalt.err (!%p280_p7)
}
  0x11   :  { %s335_s19 = smov 256   ;;  %s336_s20 = smov 16  }
  0x12   :  { %21 = dma.hbm_to_vmem [thread:$0]  %s390_s0, 8192, %s16_s10, [#allocation3], %s335_s19, %s335_s19, %s336_s20  }
  0x13   :  { %s337_s23 = smov [#allocation5]   ;;  %s284_s27 = scalar_lea.hbm %s391_s1, 256 }
  0x14   :  { %s28_s24 = sshll.u32 %s337_s23, 4  ;;  %p285_p8 = scmp.ne.s32.totalorder %s391_s1, %s284_s27  ;;  %s29_s24 = int_to_ptr.vmem [resolvable:$true] %s28_s24 }
  0x15   :  { %p288_p9 = scmp.lt.u32.totalorder %s284_s27, %s391_s1 }
  0x17   :  { %p290_p10 = pnand %p288_p9, %p285_p8 }
  0x19   :  { %293 = shalt.err (!%p290_p10)
}
  0x1a   :  { %s294_s4 = scalar_lea.vmem %s29_s24, 256  ;;  %p299_p12 = scmp.lt.s32.totalorder %s29_s24, %s29_s24 }
  0x1b   :  { %p295_p11 = scmp.ne.s32.totalorder %s29_s24, %s294_s4  ;;  %p300_p13 = scmp.lt.s32.totalorder %s294_s4, %s294_s4 }
  0x1d   :  { %p301_p0 = por %p300_p13, %p299_p12 }
  0x1f   :  { %p302_p1 = pnand %p301_p0, %p295_p11 }
  0x21   :  { %305 = shalt.err (!%p302_p1)
}
  0x22   :  { %31 = dma.hbm_to_vmem [thread:$0]  %s391_s1, 256, %s29_s24, [#allocation6]  }
  0x23   :  { %328 = dma.done.wait [#allocation3], 8192  }
  0x24   :  { %329 = vsyncadd [#allocation3], 4294959104 }
  0x25   :  { %330 = dma.done.wait [#allocation6], 256  }
  0x26   :  { %331 = vsyncadd [#allocation6], 4294967040  ;;  %v41_v0 = vld [vmem:[#allocation2 + $0x8] sm:$0xff]  ;;  %v43_v1 = vld [vmem:[#allocation2 + $0x18] sm:$0xff]  ;;  %s338_s1 = smov [#allocation7]  }
  0x27   :  { %v40_v2 = vld [vmem:[#allocation2] sm:$0xff]  ;;  %v193_v3 = vpack.c.bf16 %v43_v1, %v41_v0  ;;  %v42_v4 = vld [vmem:[#allocation2 + $0x10] sm:$0xff]  ;;  %v45_v5 = vld [vmem:[#allocation2 + $0x28] sm:$0xff]  ;;  %s183_s6 = sshll.u32 %s338_s1, 4  ;;  %s184_s6 = int_to_ptr.vmem [resolvable:$true] %s183_s6 }
  0x28   :  { %v47_v6 = vld [vmem:[#allocation2 + $0x38] sm:$0xff]  ;;  %v195_v7 = vpack.c.bf16 %v42_v4, %v40_v2  ;;  %v44_v9 = vld [vmem:[#allocation2 + $0x20] sm:$0xff]  ;;  %v46_v10 = vld [vmem:[#allocation2 + $0x30] sm:$0xff]  ;;  %s306_s7 = scalar_lea.vmem %s184_s6, 256  ;;  %p311_p3 = scmp.lt.s32.totalorder %s184_s6, %s184_s6 }
  0x29   :  { %v197_v8 = vpack.c.bf16 %v47_v6, %v45_v5  ;;  %v49_v11 = vld [vmem:[#allocation2 + $0x48] sm:$0xff]  ;;  %194 = vmatprep.subr.bf16.mxu0 %v193_v3  ;;  %v51_v12 = vld [vmem:[#allocation2 + $0x58] sm:$0xff]  ;;  %v199_v13 = vpack.c.bf16 %v46_v10, %v44_v9  ;;  %v48_v15 = vld [vmem:[#allocation2 + $0x40] sm:$0xff]  ;;  %p307_p2 = scmp.ne.s32.totalorder %s184_s6, %s306_s7  ;;  %p312_p4 = scmp.lt.s32.totalorder %s306_s7, %s306_s7 }
  0x2a   :  { %196 = vmatpush1.bf16.msra.mxu0 %v195_v7  ;;  %v201_v14 = vpack.c.bf16 %v51_v12, %v49_v11  ;;  %v50_v16 = vld [vmem:[#allocation2 + $0x50] sm:$0xff]  ;;  %v53_v17 = vld [vmem:[#allocation2 + $0x68] sm:$0xff]  ;;  %v55_v18 = vld [vmem:[#allocation2 + $0x78] sm:$0xff] }
  0x2b   :  { %198 = vmatprep.subr.bf16.mxu0 %v197_v8  ;;  %v203_v19 = vpack.c.bf16 %v50_v16, %v48_v15  ;;  %v205_v20 = vpack.c.bf16 %v55_v18, %v53_v17  ;;  %v52_v21 = vld [vmem:[#allocation2 + $0x60] sm:$0xff]  ;;  %v54_v22 = vld [vmem:[#allocation2 + $0x70] sm:$0xff]  ;;  %v57_v23 = vld [vmem:[#allocation2 + $0x88] sm:$0xff]  ;;  %p313_p5 = por %p312_p4, %p311_p3 }
  0x2c   :  { %v59_v24 = vld [vmem:[#allocation2 + $0x98] sm:$0xff]  ;;  %v207_v25 = vpack.c.bf16 %v54_v22, %v52_v21  ;;  %v56_v27 = vld [vmem:[#allocation2 + $0x80] sm:$0xff]  ;;  %v58_v28 = vld [vmem:[#allocation2 + $0x90] sm:$0xff] }
  0x2d   :  { %v209_v26 = vpack.c.bf16 %v59_v24, %v57_v23  ;;  %v61_v29 = vld [vmem:[#allocation2 + $0xa8] sm:$0xff]  ;;  %v63_v30 = vld [vmem:[#allocation2 + $0xb8] sm:$0xff]  ;;  %v211_v31 = vpack.c.bf16 %v58_v28, %v56_v27  ;;  %v60_v33 = vld [vmem:[#allocation2 + $0xa0] sm:$0xff]  ;;  %p314_p6 = pnand %p313_p5, %p307_p2 }
  0x2e   :  { %200 = vmatpush1.bf16.msra.mxu0 %v199_v13  ;;  %v213_v32 = vpack.c.bf16 %v63_v30, %v61_v29  ;;  %v62_v34 = vld [vmem:[#allocation2 + $0xb0] sm:$0xff]  ;;  %v65_v35 = vld [vmem:[#allocation2 + $0xc8] sm:$0xff]  ;;  %v67_v36 = vld [vmem:[#allocation2 + $0xd8] sm:$0xff] }
  0x2f   :  { %202 = vmatprep.subr.bf16.mxu0 %v201_v14  ;;  %v215_v37 = vpack.c.bf16 %v62_v34, %v60_v33  ;;  %v217_v38 = vpack.c.bf16 %v67_v36, %v65_v35  ;;  %v64_v39 = vld [vmem:[#allocation2 + $0xc0] sm:$0xff]  ;;  %v66_v40 = vld [vmem:[#allocation2 + $0xd0] sm:$0xff]  ;;  %v39_v41 = vld [vmem:[#allocation5 + $0x8] sm:$0xff] }
  0x30   :  { %v69_v42 = vld [vmem:[#allocation2 + $0xe8] sm:$0xff]  ;;  %v71_v43 = vld [vmem:[#allocation2 + $0xf8] sm:$0xff]  ;;  %168 = vmatprep.mubr.f32.mxu0 %v39_v41  ;;  %v219_v44 = vpack.c.bf16 %v66_v40, %v64_v39  ;;  %v68_v46 = vld [vmem:[#allocation2 + $0xe0] sm:$0xff] }
  0x31   :  { %v221_v45 = vpack.c.bf16 %v71_v43, %v69_v42  ;;  %v70_v47 = vld [vmem:[#allocation2 + $0xf0] sm:$0xff]  ;;  %v73_v48 = vld [vmem:[#allocation2 + $0x108] sm:$0xff]  ;;  %v75_v49 = vld [vmem:[#allocation2 + $0x118] sm:$0xff] }
  0x32   :  { %204 = vmatpush1.bf16.msra.mxu0 %v203_v19  ;;  %v223_v50 = vpack.c.bf16 %v70_v47, %v68_v46  ;;  %v225_v51 = vpack.c.bf16 %v75_v49, %v73_v48  ;;  %v72_v52 = vld [vmem:[#allocation2 + $0x100] sm:$0xff]  ;;  %v74_v53 = vld [vmem:[#allocation2 + $0x110] sm:$0xff]  ;;  %v77_v54 = vld [vmem:[#allocation2 + $0x128] sm:$0xff] }
  0x33   :  { %206 = vmatprep.subr.bf16.mxu0 %v205_v20  ;;  %v79_v55 = vld [vmem:[#allocation2 + $0x138] sm:$0xff]  ;;  %v227_v56 = vpack.c.bf16 %v74_v53, %v72_v52  ;;  %v76_v58 = vld [vmem:[#allocation2 + $0x120] sm:$0xff]  ;;  %v78_v59 = vld [vmem:[#allocation2 + $0x130] sm:$0xff] }
  0x34   :  { %v229_v57 = vpack.c.bf16 %v79_v55, %v77_v54  ;;  %v81_v60 = vld [vmem:[#allocation2 + $0x148] sm:$0xff]  ;;  %v83_v61 = vld [vmem:[#allocation2 + $0x158] sm:$0xff]  ;;  %v231_v62 = vpack.c.bf16 %v78_v59, %v76_v58  ;;  %v80_v0 = vld [vmem:[#allocation2 + $0x140] sm:$0xff] }
  0x35   :  { %v233_v63 = vpack.c.bf16 %v83_v61, %v81_v60  ;;  %v82_v1 = vld [vmem:[#allocation2 + $0x150] sm:$0xff]  ;;  %v85_v2 = vld [vmem:[#allocation2 + $0x168] sm:$0xff]  ;;  %v87_v3 = vld [vmem:[#allocation2 + $0x178] sm:$0xff] }
  0x36   :  { %208 = vmatpush1.bf16.msra.mxu0 %v207_v25  ;;  %v235_v4 = vpack.c.bf16 %v82_v1, %v80_v0  ;;  %v237_v5 = vpack.c.bf16 %v87_v3, %v85_v2  ;;  %v84_v6 = vld [vmem:[#allocation2 + $0x160] sm:$0xff]  ;;  %v86_v7 = vld [vmem:[#allocation2 + $0x170] sm:$0xff]  ;;  %v89_v8 = vld [vmem:[#allocation2 + $0x188] sm:$0xff] }
  0x37   :  { %210 = vmatprep.subr.bf16.mxu0 %v209_v26  ;;  %v91_v9 = vld [vmem:[#allocation2 + $0x198] sm:$0xff]  ;;  %v239_v10 = vpack.c.bf16 %v86_v7, %v84_v6  ;;  %v88_v12 = vld [vmem:[#allocation2 + $0x180] sm:$0xff]  ;;  %v90_v13 = vld [vmem:[#allocation2 + $0x190] sm:$0xff] }
  0x38   :  { %v241_v11 = vpack.c.bf16 %v91_v9, %v89_v8  ;;  %v93_v14 = vld [vmem:[#allocation2 + $0x1a8] sm:$0xff]  ;;  %v95_v15 = vld [vmem:[#allocation2 + $0x1b8] sm:$0xff]  ;;  %v243_v16 = vpack.c.bf16 %v90_v13, %v88_v12  ;;  %v92_v18 = vld [vmem:[#allocation2 + $0x1a0] sm:$0xff] }
  0x39   :  { %v245_v17 = vpack.c.bf16 %v95_v15, %v93_v14  ;;  %v94_v19 = vld [vmem:[#allocation2 + $0x1b0] sm:$0xff]  ;;  %v97_v20 = vld [vmem:[#allocation2 + $0x1c8] sm:$0xff]  ;;  %v99_v21 = vld [vmem:[#allocation2 + $0x1d8] sm:$0xff] }
  0x3a   :  { %212 = vmatpush1.bf16.msra.mxu0 %v211_v31  ;;  %v247_v22 = vpack.c.bf16 %v94_v19, %v92_v18  ;;  %v249_v23 = vpack.c.bf16 %v99_v21, %v97_v20  ;;  %v96_v24 = vld [vmem:[#allocation2 + $0x1c0] sm:$0xff]  ;;  %v98_v25 = vld [vmem:[#allocation2 + $0x1d0] sm:$0xff]  ;;  %v101_v26 = vld [vmem:[#allocation2 + $0x1e8] sm:$0xff] }
  0x3b   :  { %214 = vmatprep.subr.bf16.mxu0 %v213_v32  ;;  %v103_v27 = vld [vmem:[#allocation2 + $0x1f8] sm:$0xff]  ;;  %v251_v28 = vpack.c.bf16 %v98_v25, %v96_v24  ;;  %v100_v30 = vld [vmem:[#allocation2 + $0x1e0] sm:$0xff]  ;;  %v102_v31 = vld [vmem:[#allocation2 + $0x1f0] sm:$0xff] }
  0x3c   :  { %v253_v29 = vpack.c.bf16 %v103_v27, %v101_v26  ;;  %v255_v32 = vpack.c.bf16 %v102_v31, %v100_v30  ;;  %v38_v33 = vld [vmem:[#allocation5] sm:$0xff] }
  0x3e   :  { %216 = vmatpush1.bf16.msra.mxu0 %v215_v37 }
  0x3f   :  { %218 = vmatprep.subr.bf16.mxu0 %v217_v38 }
  0x42   :  { %220 = vmatpush1.bf16.msra.mxu0 %v219_v44 }
  0x43   :  { %222 = vmatprep.subr.bf16.mxu0 %v221_v45 }
  0x46   :  { %224 = vmatpush1.bf16.msra.mxu0 %v223_v50 }
  0x47   :  { %226 = vmatprep.subr.bf16.mxu0 %v225_v51 }
  0x4a   :  { %228 = vmatpush1.bf16.msra.mxu0 %v227_v56 }
  0x4b   :  { %230 = vmatprep.subr.bf16.mxu0 %v229_v57 }
  0x4e   :  { %232 = vmatpush1.bf16.msra.mxu0 %v231_v62 }
  0x4f   :  { %234 = vmatprep.subr.bf16.mxu0 %v233_v63 }
  0x52   :  { %236 = vmatpush1.bf16.msra.mxu0 %v235_v4 }
  0x53   :  { %238 = vmatprep.subr.bf16.mxu0 %v237_v5 }
  0x56   :  { %240 = vmatpush1.bf16.msra.mxu0 %v239_v10 }
  0x57   :  { %242 = vmatprep.subr.bf16.mxu0 %v241_v11 }
  0x5a   :  { %244 = vmatpush1.bf16.msra.mxu0 %v243_v16 }
  0x5b   :  { %246 = vmatprep.subr.bf16.mxu0 %v245_v17 }
  0x5e   :  { %248 = vmatpush1.bf16.msra.mxu0 %v247_v22 }
  0x5f   :  { %250 = vmatprep.subr.bf16.mxu0 %v249_v23 }
  0x62   :  { %252 = vmatpush1.bf16.msra.mxu0 %v251_v28 }
  0x63   :  { %254 = vmatprep.subr.bf16.mxu0 %v253_v29 }
  0x66   :  { %256 = vmatpush1.bf16.msra.mxu0 %v255_v32 }
  0x69   :  { %169 = vmatmul.mubr.f32.vlgmr.msra.gmra.mrb[0].mxu0 %v38_v33 }
 0x13c   :  { %v170_v34 = vpop.f32.mrb[0].mxu0 }
 0x13d   :  { %175 = vst [vmem:[#allocation7] sm:$0xff] %v170_v34  ;;  %v172_v35 = vpop.f32.mrb[1].mxu0 }
 0x13e   :  { %176 = vst [vmem:[#allocation7 + $0x8] sm:$0xff] %v172_v35 }
 0x13f   :  { %317 = shalt.err (!%p314_p6)
}
 0x140   :  { %s318_s10 = scalar_lea.hbm %s392_s2, 256 }
 0x141   :  { %p319_p7 = scmp.ne.s32.totalorder %s392_s2, %s318_s10  ;;  %p322_p8 = scmp.lt.u32.totalorder %s318_s10, %s392_s2 }
 0x143   :  { %p324_p9 = pnand %p322_p8, %p319_p7 }
 0x145   :  { %327 = shalt.err (!%p324_p9)
}
 0x146   :  { %186 = dma.vmem_to_hbm [thread:$0]  %s184_s6, 256, %s392_s2, [#allocation4]  }
 0x147   :  { %332 = dma.done.wait [#allocation4], 256  }
 0x148   :  { %333 = vsyncadd [#allocation4], 4294967040 }
 0x149   :  { %190 = vsyncpa [#allocation3], 1 }
 0x14a   :  { %191 = vsyncpa [#allocation6], 1 }
 0x14b   :  { %192 = vsyncpa [#allocation4], 1 }

</bundles_post_ra>
